<compile_context>
chip_gen: v6e
topology: v6e:2x2x1
jax: 0.10.0
libtpu: 0.0.40
codegen_flags: <defaults>
</compile_context>

<pallas_src>
import jax
import jax.numpy as jnp
from jax.experimental import pallas as pl
from jax.experimental.pallas import tpu as pltpu


def _round_up(x, m):
    return ((x + m - 1) // m) * m


# -------------------- fused projection + input-gate kernel --------------------
# rows (N, E) -> p = relu(rows @ proj_w^T + proj_b) -> g = p @ W_ih^T + (b_ih + b_hh)
# One batched pass for ALL rows (hypothesis tokens, true labels, all labels);
# this removes x, W_ih, b_ih, b_hh from the recurrence kernel entirely.
# Row-tiled grid for HBM/compute overlap; weights resident across the grid.

def _proj_gates_kernel(rows_ref, pwt_ref, pb_ref, wiht_ref, bg_ref, g_ref):
    p = jnp.dot(rows_ref[...], pwt_ref[...], preferred_element_type=jnp.float32)
    p = jnp.maximum(p + pb_ref[...], 0.0)
    g = jnp.dot(p, wiht_ref[...], preferred_element_type=jnp.float32) + bg_ref[...]
    g_ref[...] = g.astype(g_ref.dtype)


def proj_gates(rows, proj_w_t, proj_b, w_ih_t, b_gates, row_tile=256):
    """rows: (N, E) -> gates (N, 4H) f32.  Weights pre-transposed on the host."""
    N, E = rows.shape
    P = proj_w_t.shape[1]
    G = w_ih_t.shape[1]
    tm = min(row_tile, _round_up(N, 8))          # sublane-aligned row tile
    Np = _round_up(N, tm)
    if Np != N:
        rows = jnp.zeros((Np, E), rows.dtype).at[:N].set(rows)
    out = pl.pallas_call(
        _proj_gates_kernel,
        out_shape=jax.ShapeDtypeStruct((Np, G), jnp.float32),
        grid=(Np // tm,),
        in_specs=[pl.BlockSpec((tm, E), lambda i: (i, 0)),
                  pl.BlockSpec((E, P), lambda i: (0, 0)),
                  pl.BlockSpec((1, P), lambda i: (0, 0)),
                  pl.BlockSpec((P, G), lambda i: (0, 0)),
                  pl.BlockSpec((1, G), lambda i: (0, 0))],
        out_specs=pl.BlockSpec((tm, G), lambda i: (i, 0)),
        compiler_params=pltpu.CompilerParams(
            dimension_semantics=("parallel",)),
    )(rows, proj_w_t, proj_b, w_ih_t, b_gates)
    return out[:N]


# ---------------- label-gridded LSTM recurrence + output Linear ----------------
# grid=(L,) parallel over label candidates (sharded across TensorCores on v7x).
# Each grid step carries h/c of shape (Bp, H); only h @ W_hh^T is recomputed per
# timestep (x-side gates were hoisted).  "Shifted" semantics: the logit row for
# time t comes from the hidden state BEFORE consuming x[t], so h is stored into a
# VMEM scratch slab first and the post-(T-1) cell is never computed.  One
# lane-dense vocab matmul over the slab per grid step, written ordered (l, t, b).

def _make_lstm_gen_kernel(T, Bp, H, at_start):
    Tm1 = T - 1

    def kernel(gx_ref, labg_ref, whht_ref, woutt_ref, bout_ref, out_ref, slab_ref):
        whh_t = whht_ref[...]                     # (H, 4H), pre-transposed

        def cell(g_x, h, c):
            # PyTorch LSTM gate order: i, f, g, o (lane slices of the 4H axis)
            # TODO(synk): pad/realign gate blocks to 128-lane boundaries when H % 128 != 0.
            gates = g_x + jnp.dot(h, whh_t, preferred_element_type=jnp.float32)
            i_g = jax.nn.sigmoid(gates[:, 0 * H:1 * H])
            f_g = jax.nn.sigmoid(gates[:, 1 * H:2 * H])
            g_g = jnp.tanh(gates[:, 2 * H:3 * H])
            o_g = jax.nn.sigmoid(gates[:, 3 * H:4 * H])
            c_new = f_g * c + i_g * g_g
            h_new = o_g * jnp.tanh(c_new)
            return h_new, c_new

        h0 = jnp.zeros((Bp, H), jnp.float32)
        c0 = jnp.zeros((Bp, H), jnp.float32)
        if at_start:
            h1, c1 = cell(labg_ref[0], h0, c0)    # one step over the label gates
        else:
            h1, c1 = h0, c0
        slab_ref[pl.ds(0, Bp), :] = h1            # shifted_outputs[0] = h1

        def body(t, carry):
            h, c = carry
            h, c = cell(gx_ref[t], h, c)          # consume x[t]
            off = pl.multiple_of((t + 1) * Bp, 8)
            slab_ref[pl.ds(off, Bp), :] = h       # shifted_outputs[t+1]
            return (h, c)

        if Tm1 > 0:
            jax.lax.fori_loop(0, Tm1, body, (h1, c1), unroll=(Tm1 <= 16))

        logits = jnp.dot(slab_ref[...], woutt_ref[...],
                         preferred_element_type=jnp.float32) + bout_ref[...]
        out_ref[0] = logits.astype(out_ref.dtype)

    return kernel


def lstm_generative_logits(gx, lab_g, w_hh_t, w_out_t, b_out_p, T, at_start=True):
    """gx: (max(T-1,1), Bp, 4H) x-side gates (shared by all label candidates),
    lab_g: (L, Bp, 4H) per-candidate label gates.
    Returns (L, T*Bp, Vp) logits, rows within a candidate ordered (t, b)."""
    Tg, Bp, G = gx.shape
    L = lab_g.shape[0]
    H = w_hh_t.shape[0]
    Vp = w_out_t.shape[1]
    kernel = _make_lstm_gen_kernel(T, Bp, H, at_start)
    return pl.pallas_call(
        kernel,
        out_shape=jax.ShapeDtypeStruct((L, T * Bp, Vp), jnp.float32),
        grid=(L,),
        in_specs=[pl.BlockSpec((Tg, Bp, G), lambda l: (0, 0, 0)),   # resident
                  pl.BlockSpec((1, Bp, G), lambda l: (l, 0, 0)),    # per-candidate
                  pl.BlockSpec((H, G), lambda l: (0, 0)),           # resident
                  pl.BlockSpec((H, Vp), lambda l: (0, 0)),          # resident
                  pl.BlockSpec((1, Vp), lambda l: (0, 0))],         # resident
        out_specs=pl.BlockSpec((1, T * Bp, Vp), lambda l: (l, 0, 0)),
        scratch_shapes=[pltpu.VMEM((T * Bp, H), jnp.float32)],
        compiler_params=pltpu.CompilerParams(
            dimension_semantics=("parallel",)),
    )(gx, lab_g, w_hh_t, w_out_t, b_out_p)


# ------------------------------ host-side weight prep --------------------------
# Run ONCE at model-load time (hoisted out of forward): pre-transpose weights,
# merge LSTM biases, zero-pad the vocab projection to a 128-lane multiple.

def prepare_params(params):
    H = params["w_hh"].shape[1]
    V = params["w_out"].shape[0]
    Vp = _round_up(V, 128)
    return {
        "embed_w": params["embed_w"],
        "label_embed_w": params["label_embed_w"],
        "proj_w_t": params["proj_w"].T,                         # (E, P)
        "proj_b": params["proj_b"],                             # (1, P)
        "w_ih_t": params["w_ih"].T,                             # (P, 4H)
        "w_hh_t": params["w_hh"].T,                             # (H, 4H)
        "b_gates": params["b_ih"] + params["b_hh"],             # (1, 4H)
        "w_out_t": jnp.zeros((H, Vp), jnp.float32).at[:, :V].set(params["w_out"].T),
        "b_out_p": jnp.zeros((1, Vp), jnp.float32).at[:, :V].set(params["b_out"]),
        "H": H, "V": V, "Vp": Vp,
    }


# ----------------------------------- forward ----------------------------------

def forward(prepped, hypothesis, labels, d_out, at_start=True):
    """Returns (inf_logits_list, logits) like the PyTorch module.

    hypothesis: (T, B) int32 token ids, labels: (B,) int32 label ids.
    inf_logits_list: (d_out, T, B, n_embed),  logits: (T, B, n_embed).
    """
    # glue: embedding gathers in plain JAX
    hypo_embed = prepped["embed_w"][hypothesis]            # (T, B, E)
    hypo_label_embed = prepped["label_embed_w"][labels]    # (B, E)
    all_label_embed = prepped["label_embed_w"]             # (d_out, E)
    T, B, E = hypo_embed.shape
    H, V, Vp = prepped["H"], prepped["V"], prepped["Vp"]
    L = 1 + d_out

    # one fused matmul pass: projection+ReLU and x-side LSTM gates for ALL rows
    rows = jnp.concatenate([hypo_embed.reshape(T * B, E),
                            hypo_label_embed,
                            all_label_embed], axis=0)       # (T*B + B + d_out, E)
    g = proj_gates(rows, prepped["proj_w_t"], prepped["proj_b"],
                   prepped["w_ih_t"], prepped["b_gates"])
    G = g.shape[1]
    gx_hyp = g[:T * B].reshape(T, B, G)                     # hypothesis gates
    g_true = g[T * B:T * B + B]                             # (B, 4H) true labels
    g_all = g[T * B + B:T * B + B + d_out]                  # (d_out, 4H)

    # pad batch to a sublane multiple; keep only the T-1 consumed timesteps of gx
    Bp = _round_up(B, 8)
    Tg = max(T - 1, 1)
    gx = jnp.zeros((Tg, Bp, G), jnp.float32).at[:T - 1, :B, :].set(gx_hyp[:T - 1])
    lab_g = jnp.zeros((L, Bp, G), jnp.float32)
    lab_g = lab_g.at[0, :B, :].set(g_true)                  # l=0: true labels
    lab_g = lab_g.at[1:, :B, :].set(
        jnp.broadcast_to(g_all[:, None, :], (d_out, B, G)))  # l=k: fixed label k-1

    out = lstm_generative_logits(gx, lab_g, prepped["w_hh_t"],
                                 prepped["w_out_t"], prepped["b_out_p"],
                                 T=T, at_start=at_start)     # (L, T*Bp, Vp)
    out = out.reshape(L, T, Bp, Vp)[:, :, :B, :V]            # already (l, t, b)
    logits = out[0]                                          # true labels
    inf_logits_list = out[1:]                                # fixed label k-1
    return inf_logits_list, logits


# ------------------------------ pure-JAX reference ----------------------------

def ref_forward(params, hypothesis, labels, d_out, at_start=True):
    hypo_embed = params["embed_w"][hypothesis]
    hypo_label_embed = params["label_embed_w"][labels]
    all_label_embed = params["label_embed_w"]
    T, B, E = hypo_embed.shape
    H = params["w_hh"].shape[1]

    def proj(z):
        return jax.nn.relu(z @ params["proj_w"].T + params["proj_b"][0])

    x = proj(hypo_embed)
    true_lab = proj(hypo_label_embed)
    inf_lab = proj(all_label_embed)

    def cell(carry, xt):
        h, c = carry
        g = (xt @ params["w_ih"].T + h @ params["w_hh"].T
             + params["b_ih"][0] + params["b_hh"][0])
        i = jax.nn.sigmoid(g[:, :H]); f = jax.nn.sigmoid(g[:, H:2 * H])
        gg = jnp.tanh(g[:, 2 * H:3 * H]); o = jax.nn.sigmoid(g[:, 3 * H:])
        c2 = f * c + i * gg
        h2 = o * jnp.tanh(c2)
        return (h2, c2), h2

    def run_one(lab_proj):
        h0 = jnp.zeros((B, H), jnp.float32)
        c0 = jnp.zeros((B, H), jnp.float32)
        if at_start:
            (h1, c1), _ = cell((h0, c0), lab_proj)
        else:
            h1, c1 = h0, c0
        (_, _), outs = jax.lax.scan(cell, (h1, c1), x)
        shifted = jnp.concatenate([h1[None], outs[:-1]], axis=0)
        return shifted @ params["w_out"].T + params["b_out"][0]

    logits = run_one(true_lab)
    inf = jnp.stack([run_one(jnp.broadcast_to(inf_lab[k], (B, inf_lab.shape[1])))
                     for k in range(d_out)], axis=0)
    return inf, logits


# ------------------------------------ main -------------------------------------

if __name__ == "__main__":
    # small config consistent with the module
    n_embed, d_embed, d_proj, d_hidden, d_out = 64, 32, 32, 32, 5
    T, B = 8, 2

    key = jax.random.PRNGKey(0)
    ks = jax.random.split(key, 12)
    s = 0.1
    params = {
        "embed_w":       s * jax.random.normal(ks[0], (n_embed, d_embed), jnp.float32),
        "label_embed_w": s * jax.random.normal(ks[1], (d_out, d_embed), jnp.float32),
        "proj_w":        s * jax.random.normal(ks[2], (d_proj, d_embed), jnp.float32),
        "proj_b":        s * jax.random.normal(ks[3], (1, d_proj), jnp.float32),
        "w_ih":          s * jax.random.normal(ks[4], (4 * d_hidden, d_proj), jnp.float32),
        "w_hh":          s * jax.random.normal(ks[5], (4 * d_hidden, d_hidden), jnp.float32),
        "b_ih":          s * jax.random.normal(ks[6], (1, 4 * d_hidden), jnp.float32),
        "b_hh":          s * jax.random.normal(ks[7], (1, 4 * d_hidden), jnp.float32),
        "w_out":         s * jax.random.normal(ks[8], (n_embed, d_hidden), jnp.float32),
        "b_out":         s * jax.random.normal(ks[9], (1, n_embed), jnp.float32),
    }

    hypothesis = jax.random.randint(ks[10], (T, B), 0, n_embed, jnp.int32)
    labels = jax.random.randint(ks[11], (B,), 0, d_out, jnp.int32)

    prepped = prepare_params(params)        # one-time host-side weight prep
    inf_logits_list, logits = forward(prepped, hypothesis, labels, d_out)
    jax.block_until_ready((inf_logits_list, logits))

    inf_ref, logits_ref = ref_forward(params, hypothesis, labels, d_out)
    assert logits.shape == (T, B, n_embed)
    assert inf_logits_list.shape == (d_out, T, B, n_embed)
    assert jnp.allclose(logits, logits_ref, atol=1e-4), "logits mismatch"
    assert jnp.allclose(inf_logits_list, inf_ref, atol=1e-4), "inf logits mismatch"

    print("KERNEL_OK")
</pallas_src>

<mosaic_0001>
module attributes {stable_mosaic.version = 11 : i64} {
  func.func @_proj_gates_kernel(%arg0: i32, %arg1: memref<24x32xf32, #tpu.memory_space<vmem>>, %arg2: memref<32x32xf32, #tpu.memory_space<vmem>>, %arg3: memref<1x32xf32, #tpu.memory_space<vmem>>, %arg4: memref<32x128xf32, #tpu.memory_space<vmem>>, %arg5: memref<1x128xf32, #tpu.memory_space<vmem>>, %arg6: memref<24x128xf32, #tpu.memory_space<vmem>>) attributes {dimension_semantics = [#tpu.dimension_semantics<parallel>], iteration_bounds = array<i64: 1>, scalar_prefetch = 0 : i64, scratch_operands = 0 : i64, tpu.core_type = #tpu.core_type<tc>, window_params = [{transform_indices = @transform_0, window_bounds = array<i64: 24, 32>}, {pipeline_mode = #tpu.pipeline_mode<synchronous>, transform_indices = @transform_1, window_bounds = array<i64: 32, 32>}, {pipeline_mode = #tpu.pipeline_mode<synchronous>, transform_indices = @transform_2, window_bounds = array<i64: 1, 32>}, {pipeline_mode = #tpu.pipeline_mode<synchronous>, transform_indices = @transform_3, window_bounds = array<i64: 32, 128>}, {pipeline_mode = #tpu.pipeline_mode<synchronous>, transform_indices = @transform_4, window_bounds = array<i64: 1, 128>}, {transform_indices = @transform_5, window_bounds = array<i64: 24, 128>}]} {
    %c0 = arith.constant 0 : index
    %c0_0 = arith.constant 0 : index
    %0 = vector.load %arg1[%c0, %c0_0] : memref<24x32xf32, #tpu.memory_space<vmem>>, vector<24x32xf32>
    %c0_1 = arith.constant 0 : index
    %c0_2 = arith.constant 0 : index
    %1 = vector.load %arg2[%c0_1, %c0_2] : memref<32x32xf32, #tpu.memory_space<vmem>>, vector<32x32xf32>
    %cst = arith.constant dense<0.000000e+00> : vector<24x32xf32>
    %2 = tpu.matmul %0, %1, %cst {dimension_numbers = #tpu.dot_dimension_numbers<[1], [0], [0], [1], [0, 0, 1, 1], [], []>} : vector<24x32xf32>, vector<32x32xf32>, vector<24x32xf32> -> vector<24x32xf32>
    %c0_3 = arith.constant 0 : index
    %c0_4 = arith.constant 0 : index
    %3 = vector.load %arg3[%c0_3, %c0_4] : memref<1x32xf32, #tpu.memory_space<vmem>>, vector<1x32xf32>
    %4 = vector.broadcast %3 : vector<1x32xf32> to vector<24x32xf32>
    %5 = arith.addf %2, %4 : vector<24x32xf32>
    %cst_5 = arith.constant 0.000000e+00 : f32
    %6 = vector.broadcast %cst_5 : f32 to vector<24x32xf32>
    %7 = arith.maximumf %5, %6 : vector<24x32xf32>
    %c0_6 = arith.constant 0 : index
    %c0_7 = arith.constant 0 : index
    %8 = vector.load %arg4[%c0_6, %c0_7] : memref<32x128xf32, #tpu.memory_space<vmem>>, vector<32x128xf32>
    %cst_8 = arith.constant dense<0.000000e+00> : vector<24x128xf32>
    %9 = tpu.matmul %7, %8, %cst_8 {dimension_numbers = #tpu.dot_dimension_numbers<[1], [0], [0], [1], [0, 0, 1, 1], [], []>} : vector<24x32xf32>, vector<32x128xf32>, vector<24x128xf32> -> vector<24x128xf32>
    %c0_9 = arith.constant 0 : index
    %c0_10 = arith.constant 0 : index
    %10 = vector.load %arg5[%c0_9, %c0_10] : memref<1x128xf32, #tpu.memory_space<vmem>>, vector<1x128xf32>
    %11 = vector.broadcast %10 : vector<1x128xf32> to vector<24x128xf32>
    %12 = arith.addf %9, %11 : vector<24x128xf32>
    %c0_11 = arith.constant 0 : index
    %c0_12 = arith.constant 0 : index
    %13 = vector.load %arg6[%c0_11, %c0_12] : memref<24x128xf32, #tpu.memory_space<vmem>>, vector<24x128xf32>
    tpu.vector_store %arg6[%c0_11, %c0_12], %12 {strides = array<i32>} : memref<24x128xf32, #tpu.memory_space<vmem>>, vector<24x128xf32>,
    return
  }
  func.func @transform_0(%arg0: i32) -> (i32, i32) {
    %c0_i32 = arith.constant 0 : i32
    %c0_i32_0 = arith.constant 0 : i32
    return %arg0, %c0_i32 : i32, i32
  }
  func.func @transform_1(%arg0: i32) -> (i32, i32) {
    %c0_i32 = arith.constant 0 : i32
    %c0_i32_0 = arith.constant 0 : i32
    %c0_i32_1 = arith.constant 0 : i32
    return %c0_i32, %c0_i32_0 : i32, i32
  }
  func.func @transform_2(%arg0: i32) -> (i32, i32) {
    %c0_i32 = arith.constant 0 : i32
    %c0_i32_0 = arith.constant 0 : i32
    %c0_i32_1 = arith.constant 0 : i32
    return %c0_i32, %c0_i32_0 : i32, i32
  }
  func.func @transform_3(%arg0: i32) -> (i32, i32) {
    %c0_i32 = arith.constant 0 : i32
    %c0_i32_0 = arith.constant 0 : i32
    %c0_i32_1 = arith.constant 0 : i32
    return %c0_i32, %c0_i32_0 : i32, i32
  }
  func.func @transform_4(%arg0: i32) -> (i32, i32) {
    %c0_i32 = arith.constant 0 : i32
    %c0_i32_0 = arith.constant 0 : i32
    %c0_i32_1 = arith.constant 0 : i32
    return %c0_i32, %c0_i32_0 : i32, i32
  }
  func.func @transform_5(%arg0: i32) -> (i32, i32) {
    %c0_i32 = arith.constant 0 : i32
    %c0_i32_0 = arith.constant 0 : i32
    return %arg0, %c0_i32 : i32, i32
  }
}

</mosaic_0001>

<bundles_post_ra>
// kernel: tpu_custom_call.1
= control target key start
LH: loop header
LB: loop body
LE: loop exit
PB: predicated region body
PF: predicated region fallthrough
CT: control target
= control target key end

     0   :  { %10 = vsyncpa [#allocation3], 0  ;;  %s520_s0 = inlined_call_operand.hbm [shape: f32[24,32], index: 0, kind: input, shape index: {}]   ;;  %s521_s1 = inlined_call_operand.hbm [shape: f32[32,32], index: 1, kind: input, shape index: {}]   ;;  %s522_s2 = inlined_call_operand.vmem [shape: f32[1,32], index: 2, kind: input, shape index: {}]   ;;  %s523_s3 = inlined_call_operand.hbm [shape: f32[32,128], index: 3, kind: input, shape index: {}]   ;;  %s524_s4 = inlined_call_operand.vmem [shape: f32[1,128], index: 4, kind: input, shape index: {}]   ;;  %s525_s5 = inlined_call_operand.hbm [shape: f32[24,128], index: 5, kind: output, shape index: {}]  }
   0x1   :  { %11 = vsyncpa [#allocation6], 0 }
   0x2   :  { %12 = vsyncpa [#allocation4], 0  ;;  %s440_s18 = smov [#allocation5]   ;;  %s441_s20 = smov [#allocation2]  }
   0x3   :  { %s30_s19 = sshll.u32 %s440_s18, 4  ;;  %s18_s21 = sshll.u32 %s441_s20, 4  ;;  %s31_s19 = int_to_ptr.vmem [resolvable:$true] %s30_s19  ;;  %s19_s21 = int_to_ptr.vmem [resolvable:$true] %s18_s21 }
   0x4   :  { %s362_s22 = scalar_lea.vmem %s31_s19, 512  ;;  %p367_p1 = scmp.lt.s32.totalorder %s31_s19, %s31_s19 }
   0x5   :  { %p363_p0 = scmp.ne.s32.totalorder %s31_s19, %s362_s22  ;;  %p368_p2 = scmp.lt.s32.totalorder %s362_s22, %s362_s22 }
   0x7   :  { %p369_p3 = por %p368_p2, %p367_p1 }
   0x9   :  { %p370_p4 = pnand %p369_p3, %p363_p0 }
   0xb   :  { %373 = shalt.err (!%p370_p4)
}
   0xc   :  { %s442_s23 = smov 128   ;;  %s443_s24 = smov 8  }
   0xd   :  { %36 = dma.hbm_to_vmem [thread:$0]  %s521_s1, 512, %s31_s19, [#allocation6], %s442_s23, %s442_s23, %s443_s24  }
   0xe   :  { %s382_s27 = scalar_lea.vmem %s19_s21, 384  ;;  %p387_p6 = scmp.lt.s32.totalorder %s19_s21, %s19_s21 }
   0xf   :  { %p383_p5 = scmp.ne.s32.totalorder %s19_s21, %s382_s27  ;;  %p388_p7 = scmp.lt.s32.totalorder %s382_s27, %s382_s27 }
  0x11   :  { %p389_p8 = por %p388_p7, %p387_p6 }
  0x13   :  { %p390_p9 = pnand %p389_p8, %p383_p5 }
  0x15   :  { %393 = shalt.err (!%p390_p9)
}
  0x16   :  { %24 = dma.hbm_to_vmem [thread:$0]  %s520_s0, 384, %s19_s21, [#allocation3], %s442_s23, %s442_s23, %s443_s24  }
  0x17   :  { %s444_s30 = smov [#allocation7]  }
  0x18   :  { %s44_s6 = sshll.u32 %s444_s30, 4  ;;  %s45_s6 = int_to_ptr.vmem [resolvable:$true] %s44_s6 }
  0x19   :  { %s402_s7 = scalar_lea.vmem %s45_s6, 512  ;;  %p407_p11 = scmp.lt.s32.totalorder %s45_s6, %s45_s6 }
  0x1a   :  { %p403_p10 = scmp.ne.s32.totalorder %s45_s6, %s402_s7  ;;  %p408_p12 = scmp.lt.s32.totalorder %s402_s7, %s402_s7 }
  0x1c   :  { %p409_p13 = por %p408_p12, %p407_p11 }
  0x1e   :  { %p410_p0 = pnand %p409_p13, %p403_p10 }
  0x20   :  { %413 = shalt.err (!%p410_p0)
}
  0x21   :  { %50 = dma.hbm_to_vmem [thread:$0]  %s523_s3, 512, %s45_s6, [#allocation6], %s442_s23, %s442_s23, %s443_s24  }
  0x22   :  { %434 = dma.done.wait [#allocation3], 384  }
  0x23   :  { %435 = vsyncadd [#allocation3], 4294966912 }
  0x24   :  { %436 = dma.done.wait [#allocation6], 1024  }
  0x25   :  { %437 = vsyncadd [#allocation6], 4294966272  ;;  %v445_v0 = vmov 0.0   ;;  %vm446_vm0 = vmmov 0   ;;  %v68_v1 = vld [vmem:[#allocation5 + $0x18] sm:$0xff]  ;;  %v67_v2 = vld [vmem:[#allocation5 + $0x10] sm:$0xff] }
  0x26   :  { %312 = vmatprep.subr.mxu0 %v445_v0  ;;  %320 = vmatprep.mubr.msk.f32.mxu0 %vm446_vm0, %v445_v0  ;;  %v66_v3 = vld [vmem:[#allocation5 + $0x8] sm:$0xff]  ;;  %v172_v4 = vld [vmem:[#allocation7 + $0x18] sm:$0xff]  ;;  %v65_v5 = vld [vmem:[#allocation5] sm:$0xff]  ;;  %vm76_vm1 = vcmask 261120   ;;  %s447_s10 = smov [#allocation8]  }
  0x27   :  { %329 = vmatprep.subr.mxu1 %v445_v0  ;;  %337 = vmatprep.mubr.msk.f32.mxu1 %vm446_vm0, %v445_v0  ;;  %v62_v6 = vld [vmem:[#allocation2] sm:$0xff]  ;;  %v63_v7 = vld [vmem:[#allocation2 + $0x8] sm:$0xff]  ;;  %v64_v8 = vld [vmem:[#allocation2 + $0x10] sm:$0xff]  ;;  %s277_s11 = sshll.u32 %s447_s10, 4  ;;  %s278_s11 = int_to_ptr.vmem [resolvable:$true] %s277_s11 }
  0x28   :  { %313 = vmatpush3.msra.mxu0 %v68_v1  ;;  %330 = vmatpush3.msra.mxu1 %v172_v4  ;;  %v171_v9 = vld [vmem:[#allocation7 + $0x10] sm:$0xff]  ;;  %v170_v10 = vld [vmem:[#allocation7 + $0x8] sm:$0xff]  ;;  %v169_v11 = vld [vmem:[#allocation7] sm:$0xff]  ;;  %s414_s12 = scalar_lea.vmem %s278_s11, 384  ;;  %p419_p2 = scmp.lt.s32.totalorder %s278_s11, %s278_s11 }
  0x29   :  { %314 = vmatprep.subr.mxu0 %v445_v0  ;;  %331 = vmatprep.subr.mxu1 %v445_v0  ;;  %v290_v12 = vld [vmem:[%s522_s2] ss:$0 sm:$0xff]  ;;  %p415_p1 = scmp.ne.s32.totalorder %s278_s11, %s414_s12  ;;  %p420_p3 = scmp.lt.s32.totalorder %s414_s12, %s414_s12 }
  0x2a   :  { %315 = vmatpush3.msra.mxu0 %v67_v2  ;;  %332 = vmatpush3.msra.mxu1 %v171_v9  ;;  %v294_v25 = vld [vmem:[%s524_s4] ss:$0 sm:$0xff] }
  0x2b   :  { %316 = vmatprep.subr.mxu0 %v445_v0  ;;  %333 = vmatprep.subr.mxu1 %v445_v0  ;;  %p421_p4 = por %p420_p3, %p419_p2 }
  0x2c   :  { %317 = vmatpush3.msra.mxu0 %v66_v3  ;;  %334 = vmatpush3.msra.mxu1 %v170_v10 }
  0x2d   :  { %318 = vmatprep.subr.mxu0 %v445_v0  ;;  %335 = vmatprep.subr.mxu1 %v445_v0  ;;  %p422_p5 = pnand %p421_p4, %p415_p1 }
  0x2e   :  { %319 = vmatpush3.msra.mxu0 %v65_v5  ;;  %336 = vmatpush3.msra.mxu1 %v169_v11 }
  0x2f   :  { %321 = vmatmul.mubr.msk.f32.vlgmr.msra.gmra.mxu0 %vm76_vm1, %v62_v6 }
  0x30   :  { %323 = vmatprep.mubr.msk.f32.mxu0 %vm446_vm0, %v445_v0 }
  0x33   :  { %324 = vmatmul.mubr.msk.f32.gmra.mxu0 %vm76_vm1, %v63_v7 }
  0x34   :  { %326 = vmatprep.mubr.msk.f32.mxu0 %vm446_vm0, %v445_v0 }
  0x37   :  { %327 = vmatmul.mubr.msk.f32.gmra.mxu0 %vm76_vm1, %v64_v8 }
  0xef   :  { %v152_v13 = vpop.f32.mrf.mxu0 }
  0xf0   :  { %v153_v14 = vadd.f32 %v290_v12, %v152_v13 }
  0xf1   :  { %v322_v15 = vpop.f32.mrf.mxu0 }
  0xf2   :  { %v166_v16 = vmax.f32 %v153_v14, 0.0 }
  0xf3   :  { %v157_v17 = vpop.f32.mrf.mxu0 }
  0xf4   :  { %v158_v18 = vadd.f32 %v290_v12, %v157_v17  ;;  %338 = vmatmul.mubr.msk.f32.vlgmr.msra.gmra.mxu1 %vm76_vm1, %v166_v16 }
  0xf5   :  { %v325_v19 = vpop.f32.mrf.mxu0  ;;  %340 = vmatprep.mubr.msk.f32.mxu1 %vm446_vm0, %v445_v0 }
  0xf6   :  { %v167_v20 = vmax.f32 %v158_v18, 0.0 }
  0xf7   :  { %v162_v21 = vpop.f32.mrf.mxu0 }
  0xf8   :  { %v163_v22 = vadd.f32 %v290_v12, %v162_v21  ;;  %341 = vmatmul.mubr.msk.f32.gmra.mxu1 %vm76_vm1, %v167_v20 }
  0xf9   :  { %v328_v23 = vpop.f32.mrf.mxu0  ;;  %343 = vmatprep.mubr.msk.f32.mxu1 %vm446_vm0, %v445_v0 }
  0xfa   :  { %v168_v24 = vmax.f32 %v163_v22, 0.0 }
  0xfc   :  { %344 = vmatmul.mubr.msk.f32.gmra.mxu1 %vm76_vm1, %v168_v24 }
 0x1b4   :  { %v255_v26 = vpop.f32.mrf.mxu1 }
 0x1b5   :  { %v256_v27 = vadd.f32 %v294_v25, %v255_v26 }
 0x1b6   :  { %v339_v28 = vpop.f32.mrf.mxu1 }
 0x1b7   :  { %269 = vst [vmem:[#allocation8] sm:$0xff] %v256_v27 }
 0x1b8   :  { %v260_v29 = vpop.f32.mrf.mxu1 }
 0x1b9   :  { %v261_v30 = vadd.f32 %v294_v25, %v260_v29 }
 0x1ba   :  { %v342_v31 = vpop.f32.mrf.mxu1 }
 0x1bb   :  { %270 = vst [vmem:[#allocation8 + $0x8] sm:$0xff] %v261_v30 }
 0x1bc   :  { %v265_v32 = vpop.f32.mrf.mxu1 }
 0x1bd   :  { %v266_v33 = vadd.f32 %v294_v25, %v265_v32 }
 0x1be   :  { %v345_v34 = vpop.f32.mrf.mxu1 }
 0x1bf   :  { %271 = vst [vmem:[#allocation8 + $0x10] sm:$0xff] %v266_v33 }
 0x1c0   :  { %425 = shalt.err (!%p422_p5)
}
 0x1c1   :  { %283 = dma.vmem_to_hbm [thread:$0]  %s278_s11, 384, %s525_s5, [#allocation4], %s442_s23, %s442_s23, %s443_s24  }
 0x1c2   :  { %438 = dma.done.wait [#allocation4], 384  }
 0x1c3   :  { %439 = vsyncadd [#allocation4], 4294966912 }
 0x1c4   :  { %287 = vsyncpa [#allocation3], 1 }
 0x1c5   :  { %288 = vsyncpa [#allocation6], 1 }
 0x1c6   :  { %289 = vsyncpa [#allocation4], 1 }

</bundles_post_ra>
